<compile_context>
chip_gen: v7x
topology: tpu7x:2x2x1
jax: 0.10.0
libtpu: 0.0.40
codegen_flags: <defaults>
</compile_context>

<pallas_src>
import numpy as np
import jax
import jax.numpy as jnp
from jax.experimental import pallas as pl
from jax.experimental.pallas import tpu as pltpu


def _make_pe_kernel(T):
    def pe_kernel(times_ref, inv_ref, phase_ref, out_ref):
        # times_ref: (TILE_B, T, 1)    f32  -- time on sublanes, size-1 lane dim
        # inv_ref:   (1, 2d)           f32  -- 1/timescales duplicated over both halves
        # phase_ref: (1, 2d)           f32  -- [0]*d ++ [pi/2]*d
        # out_ref:   (TILE_B, 2T, 2d)  f32
        #
        # (TILE_B, T, 1) * (1, 2d) -> (TILE_B, T, 2d): lane splat of the per-(b,t)
        # scalar across 2d lanes, elementwise multiply by reciprocal timescales.
        scaled = times_ref[...] * inv_ref[...]
        # Single transcendental per element: first d lanes -> sin(x), last d lanes
        # -> sin(x + pi/2) == cos(x)  (== torch.cat([sin, cos], -1)).
        pe = jnp.sin(scaled + phase_ref[...])
        # torch.cat([pe, pe], dim=1): duplicated lane-dense store along time.
        out_ref[:, :T, :] = pe
        out_ref[:, T:, :] = pe

    return pe_kernel


def _pick_tile_b(B, T, two_d, budget_bytes=12 << 20):
    """Largest batch tile whose output block fits a ~12 MiB budget (so 2x the
    double-buffered block stays well inside a 32 MiB scoped-VMEM limit), shrunk
    to a divisor of B so every grid step is a full block."""
    per_batch_out_bytes = 2 * T * two_d * 4
    tile = max(1, min(B, budget_bytes // max(per_batch_out_bytes, 1)))
    while B % tile:
        tile -= 1
    return int(tile)


def positional_encoding_tf(P_time, d_model, max_len=500, tile_b=None):
    """P_time: (T, B, 1) array. Returns (B, 2*T, 1, 2*d_model) float32."""
    T, B, _ = P_time.shape
    two_d = 2 * d_model  # best perf when this is a multiple of 128 (lane width)

    # Deterministic "parameters" from __init__ (no checkpoint): timescale table,
    # its reciprocal (duplicated for the sin/cos halves), and the phase vector.
    timescales = (max_len ** np.linspace(0.0, 1.0, d_model)).astype(np.float32)
    inv = (1.0 / timescales).astype(np.float32)
    inv2 = jnp.asarray(np.concatenate([inv, inv])[None, :])                   # (1, 2d)
    phase = jnp.asarray(
        np.concatenate([np.zeros(d_model, np.float32),
                        np.full(d_model, np.float32(np.pi / 2.0))])[None, :]  # (1, 2d)
    )

    # The module's permute(1,0,2,3) has to reorder (T, B) somewhere; pay it on the
    # tiny (T*B) input (0.4% of the output's HBM traffic) rather than the output.
    times_bt1 = jnp.transpose(P_time, (1, 0, 2)).astype(jnp.float32)          # (B, T, 1)

    if tile_b is None:
        tile_b = _pick_tile_b(B, T, two_d)
    grid_b = B // tile_b

    cost = pl.CostEstimate(
        flops=2 * B * T * two_d,                                  # mul + add
        transcendentals=B * T * two_d,                            # one sin per elem
        bytes_accessed=4 * (B * T + 2 * two_d + B * 2 * T * two_d),
    )

    out_b2t2d = pl.pallas_call(
        _make_pe_kernel(T),
        out_shape=jax.ShapeDtypeStruct((B, 2 * T, two_d), jnp.float32),
        grid=(grid_b,),
        in_specs=[
            pl.BlockSpec((tile_b, T, 1), lambda i: (i, 0, 0)),    # per-batch-tile times
            pl.BlockSpec((1, two_d), lambda i: (0, 0)),           # resident constants
            pl.BlockSpec((1, two_d), lambda i: (0, 0)),
        ],
        out_specs=pl.BlockSpec((tile_b, 2 * T, two_d), lambda i: (i, 0, 0)),
        compiler_params=pltpu.CompilerParams(
            dimension_semantics=("parallel",),                    # shard B across TCs (v7x)
            vmem_limit_bytes=32 * 1024 * 1024,
        ),
        cost_estimate=cost,
    )(times_bt1, inv2, phase)

    # Singleton-axis insert on a contiguous array: metadata-only, no copy.
    return out_b2t2d[:, :, None, :]


def _reference(P_time, d_model, max_len=500):
    """Pure-numpy mirror of the PyTorch forward (float32, division path)."""
    timescales = (max_len ** np.linspace(0.0, 1.0, d_model)).astype(np.float32)
    pt = np.asarray(P_time, dtype=np.float32)                       # (T, B, 1)
    scaled = pt[:, :, :, None] / timescales[None, None, None]       # (T, B, 1, d)
    pe = np.concatenate([np.sin(scaled), np.cos(scaled)], axis=-1)  # (T, B, 1, 2d)
    pe = np.transpose(pe, (1, 0, 2, 3)).astype(np.float32)          # (B, T, 1, 2d)
    return np.concatenate([pe, pe], axis=1)                         # (B, 2T, 1, 2d)


if __name__ == "__main__":
    d_model = 64      # -> 2*d_model = 128 lanes (one full vreg lane width)
    max_len = 500
    T, B = 8, 4

    key = jax.random.PRNGKey(0)
    # Time stamps in [0, 100), shape (T, B, 1) as implied by the forward's
    # unsqueeze(2) + permute(1,0,2,3).
    P_time = jax.random.uniform(key, (T, B, 1), dtype=jnp.float32) * 100.0

    # tile_b=2 exercises the multi-step, parallel batch grid (grid=(2,)).
    out = positional_encoding_tf(P_time, d_model, max_len=max_len, tile_b=2)
    out = jax.block_until_ready(out)

    ref = _reference(np.asarray(P_time), d_model, max_len=max_len)
    assert out.shape == ref.shape == (B, 2 * T, 1, 2 * d_model), out.shape
    assert out.dtype == jnp.float32
    np.testing.assert_allclose(np.asarray(out), ref, rtol=1e-4, atol=1e-4)

    print("KERNEL_OK")
</pallas_src>

<mosaic_0001>
module attributes {stable_mosaic.version = 11 : i64} {
  func.func @pe_kernel(%arg0: i32, %arg1: memref<2x8x1xf32, #tpu.memory_space<vmem>>, %arg2: memref<1x128xf32, #tpu.memory_space<vmem>>, %arg3: memref<1x128xf32, #tpu.memory_space<vmem>>, %arg4: memref<2x16x128xf32, #tpu.memory_space<vmem>>) attributes {dimension_semantics = [#tpu.dimension_semantics<parallel>], iteration_bounds = array<i64: 2>, scalar_prefetch = 0 : i64, scratch_operands = 0 : i64, tpu.core_type = #tpu.core_type<tc>, window_params = [{transform_indices = @transform_0, window_bounds = array<i64: 2, 8, 1>}, {pipeline_mode = #tpu.pipeline_mode<synchronous>, transform_indices = @transform_1, window_bounds = array<i64: 1, 128>}, {pipeline_mode = #tpu.pipeline_mode<synchronous>, transform_indices = @transform_2, window_bounds = array<i64: 1, 128>}, {transform_indices = @transform_3, window_bounds = array<i64: 2, 16, 128>}]} {
    %c0 = arith.constant 0 : index
    %c0_0 = arith.constant 0 : index
    %c0_1 = arith.constant 0 : index
    %0 = vector.load %arg1[%c0, %c0_0, %c0_1] : memref<2x8x1xf32, #tpu.memory_space<vmem>>, vector<2x8x1xf32>
    %c0_2 = arith.constant 0 : index
    %c0_3 = arith.constant 0 : index
    %1 = vector.load %arg2[%c0_2, %c0_3] : memref<1x128xf32, #tpu.memory_space<vmem>>, vector<1x128xf32>
    %2 = vector.shape_cast %1 : vector<1x128xf32> to vector<1x1x128xf32>
    %3 = vector.broadcast %0 : vector<2x8x1xf32> to vector<2x8x128xf32>
    %4 = vector.broadcast %2 : vector<1x1x128xf32> to vector<2x8x128xf32>
    %5 = arith.mulf %3, %4 : vector<2x8x128xf32>
    %c0_4 = arith.constant 0 : index
    %c0_5 = arith.constant 0 : index
    %6 = vector.load %arg3[%c0_4, %c0_5] : memref<1x128xf32, #tpu.memory_space<vmem>>, vector<1x128xf32>
    %7 = vector.shape_cast %6 : vector<1x128xf32> to vector<1x1x128xf32>
    %8 = vector.broadcast %7 : vector<1x1x128xf32> to vector<2x8x128xf32>
    %9 = arith.addf %5, %8 : vector<2x8x128xf32>
    %10 = math.sin %9 : vector<2x8x128xf32>
    %c0_6 = arith.constant 0 : index
    %c0_7 = arith.constant 0 : index
    %c0_8 = arith.constant 0 : index
    %11 = vector.load %arg4[%c0_6, %c0_7, %c0_8] : memref<2x16x128xf32, #tpu.memory_space<vmem>>, vector<2x8x128xf32>
    tpu.vector_store %arg4[%c0_6, %c0_7, %c0_8], %10 {strides = array<i32>} : memref<2x16x128xf32, #tpu.memory_space<vmem>>, vector<2x8x128xf32>,
    %c0_9 = arith.constant 0 : index
    %c8 = arith.constant 8 : index
    %c0_10 = arith.constant 0 : index
    %12 = vector.load %arg4[%c0_9, %c8, %c0_10] : memref<2x16x128xf32, #tpu.memory_space<vmem>>, vector<2x8x128xf32>
    tpu.vector_store %arg4[%c0_9, %c8, %c0_10], %10 {strides = array<i32>} : memref<2x16x128xf32, #tpu.memory_space<vmem>>, vector<2x8x128xf32>,
    return
  }
  func.func @transform_0(%arg0: i32) -> (i32, i32, i32) {
    %c0_i32 = arith.constant 0 : i32
    %c0_i32_0 = arith.constant 0 : i32
    %c0_i32_1 = arith.constant 0 : i32
    return %arg0, %c0_i32, %c0_i32_0 : i32, i32, i32
  }
  func.func @transform_1(%arg0: i32) -> (i32, i32) {
    %c0_i32 = arith.constant 0 : i32
    %c0_i32_0 = arith.constant 0 : i32
    %c0_i32_1 = arith.constant 0 : i32
    return %c0_i32, %c0_i32_0 : i32, i32
  }
  func.func @transform_2(%arg0: i32) -> (i32, i32) {
    %c0_i32 = arith.constant 0 : i32
    %c0_i32_0 = arith.constant 0 : i32
    %c0_i32_1 = arith.constant 0 : i32
    return %c0_i32, %c0_i32_0 : i32, i32
  }
  func.func @transform_3(%arg0: i32) -> (i32, i32, i32) {
    %c0_i32 = arith.constant 0 : i32
    %c0_i32_0 = arith.constant 0 : i32
    %c0_i32_1 = arith.constant 0 : i32
    return %arg0, %c0_i32, %c0_i32_0 : i32, i32, i32
  }
}

</mosaic_0001>

<bundles_post_ra>
// kernel: tpu_custom_call.1
= control target key start
LH: loop header
LB: loop body
LE: loop exit
PB: predicated region body
PF: predicated region fallthrough
CT: control target
= control target key end

     0   :  { %8 = vsyncpa [#allocation3], 0  ;;  %s855_s0 = inlined_call_operand.vmem [shape: f32[4,8,1], index: 0, kind: input, shape index: {}]   ;;  %s856_s1 = inlined_call_operand.vmem [shape: f32[1,128], index: 1, kind: input, shape index: {}]   ;;  %s857_s2 = inlined_call_operand.vmem [shape: f32[1,128], index: 2, kind: input, shape index: {}]   ;;  %s858_s3 = inlined_call_operand.hbm [shape: f32[4,16,128], index: 3, kind: output, shape index: {}]  }
   0x1   :  { %10 = vsyncpa [#allocation3 + $0x1], 0  ;;  %s675_s12 = smov 0   ;;  %s677_s13 = smov 0  }
   0x2   :  { %s679_s14 = smov 0   ;;  %s681_s15 = smov 0  }
   0x3 LB: > { %s696_s16 = sadd.s32 4294967295, %s643_s15   ;;  %s491_s17 = sadd.s32 4294967294, %s643_s15   ;;  %s643_s15 = sphi %s681_s15, %s866_s15   ;;  %s639_s14 = sphi %s679_s14, %s865_s14   ;;  %s635_s13 = sphi %s677_s13, %s864_s13   ;;  %s631_s12 = sphi %s675_s12, %s863_s12  }
   0x4   : > { %s700_s18 = sadd.s32 1, %s643_s15   ;;  %s91_s19 = sadd.s32 1, %s639_s14 }
   0x5   : > { %s88_s20 = ssub.s32 %s643_s15, %s700_s18  ;;  %p101_p0 = scmp.ne.s32.totalorder %s639_s14, %s635_s13 }
   0x6   : > { %p89_p1 = scmp.eq.s32.totalorder %s88_s20, 0  ;;  %p102_p2 = scmp.eq.s32.totalorder %s696_s16, 1 }
   0x7   : > { %p107_p3 = scmp.ne.s32.totalorder %s635_s13, %s631_s12  ;;  %p108_p4 = scmp.eq.s32.totalorder %s491_s17, 1 }
   0x8   : > { %s711_s21 = scalar_select %p89_p1, %s639_s14, %s91_s19  }
   0x9   : > { %p713_p5 = por %p102_p2, %p101_p0  ;;  %p717_p6 = por %p108_p4, %p107_p3 }
   0xa   : > { %p494_p7 = scmp.ge.s32.totalorder %s643_s15, 1  ;;  %p141_p8 = scmp.lt.s32.totalorder %s643_s15, 3 }
   0xc   : > { %p142_p9 = pnand %p494_p7, %p141_p8 }
   0xd   : > { %s496_s24 = sshll.u32 (!%p142_p9), %s696_s16, 1  ;;  %v645_v0 = vmov (!%p142_p9), 0   ;;  %v498_v3 = vld [vmem:[%s856_s1] ss:$0 sm:$0xff] (!%p142_p9)  ;;  %v646_v27 = vmov (!%p142_p9), 683565275  }
   0xe   : > { %145 = sbr.rel (%p142_p9) target bundleno = 262 (0x106), region = 32  ;;  %572 = vset.pattern.permute.xlu0 (!%p142_p9), %v645_v0  ;;  %p166_p10 = scmp.lt.s32.totalorder (!%p142_p9), %s496_s24, 3  ;;  %v499_v4 = vld [vmem:[%s857_s2] ss:$0 sm:$0xff] (!%p142_p9)  ;;  %v647_v31 = vmov (!%p142_p9), 2475754826  }
   0xf   : > { %v648_v33 = vmov (!%p142_p9), 2131351028   ;;  %v649_v35 = vmov (!%p142_p9), 2102212464   ;;  %v650_v37 = vmov (!%p142_p9), 920167782  }
  0x10   : > { %v651_v44 = vmov (!%p142_p9), 1326507024   ;;  %s162_s6 = sand.u32 (!%p142_p9), 1, %s635_s13   ;;  %s515_s9 = sshll.u32 (!%p142_p9), %s696_s16, 9 }
  0x11   : > { %s495_s7 = sshll.u32 (!%p142_p9), %s162_s6, 5  ;;  %s807_s19 = scalar_lea.hbm (!%p142_p9), %s858_s3, %s515_s9 }
  0x12   : > { %s164_s8 = scalar_lea.vmem (!%p142_p9), [#allocation2], %s495_s7  ;;  %s814_s16 = scalar_lea.sflag (!%p142_p9), [#allocation3], %s162_s6 }
  0x13   : > { %s429_s10 = sshll.u32 (!%p142_p9), %s164_s8, 4  ;;  %s809_s10 = int_to_ptr.vmem [resolvable:$true] %s429_s10 }
  0x14   : > { %s581_s20 = scalar_lea.vmem (!%p142_p9), %s809_s10, 512 }
  0x15   : > { %s868_s24 = smov (!%p166_p10, %s496_s24), 3  ;;  %p582_p11 = scmp.ne.s32.totalorder %s809_s10, %s581_s20 }
  0x16   : > { %s497_s25 = sshll.u32 %s868_s24, 3  ;;  %s652_s24 = smov [#allocation2]  }
  0x17   : > { %s169_s28 = scalar_lea.vmem %s855_s0, %s497_s25  ;;  %p583_p12 = pnand %p582_p11, %p713_p5 }
  0x18   : > { %v172_v1 = vld [vmem:[%s169_s28] sm:$0xff]  ;;  %v173_v2 = vld [vmem:[%s169_s28 + $0x8] sm:$0xff]  ;;  %s585_s25 = sshll.u32 %s652_s24, 4  ;;  %s586_s25 = int_to_ptr.vmem [resolvable:$false] %s585_s25 }
  0x19   : > { %177 = vperm.xlu0 %572, %v172_v1   ;;  %p584_p13 = pneg %p583_p12  ;;  %s587_s26 = scalar_lea.vmem %s586_s25, 1024 }
  0x1a   : > { %p588_p0 = scmp.lt.s32.totalorder %s809_s10, %s586_s25  ;;  %p589_p1 = scmp.lt.s32.totalorder %s587_s26, %s581_s20 }
  0x1c   : > { %p590_p2 = por %p589_p1, %p588_p0 }
  0x1d   : > { %182 = vperm.xlu0 %572, %v173_v2  }
  0x1e   : > { %p591_p3 = pnand %p590_p2, %p584_p13 }
  0x98   : > { %v178_v5 = vpop.permute.xlu0 %177 }
  0x99   : > { %v191_v6 = vmul.f32 %v498_v3, %v178_v5 }
  0x9b   : > { %v733_v7 = vadd.f32 %v499_v4, %v191_v6 }
  0x9c   : > { %v183_v8 = vpop.permute.xlu0 %182 }
  0x9d   : > { %v202_v9 = vand.u32 2147483647, %v733_v7  ;;  %v205_v10 = vand.u32 2139095040, %v733_v7  ;;  %v192_v11 = vmul.f32 %v498_v3, %v183_v8  ;;  %vm204_vm14 = vcmp.lt.s32.totalorder %v733_v7, 0 }
  0x9f   : > { %v206_v12 = vshrl.u32 %v205_v10, 23  ;;  %v209_v13 = vand.u32 8388607, %v202_v9  ;;  %v739_v14 = vadd.f32 %v499_v4, %v192_v11  ;;  %vm203_vm15 = vcmp.le.f32.partialorder %v202_v9, 0.7853982 }
  0xa1   : > { %v500_v15 = vadd.s32 4294967169, %v206_v12  ;;  %v309_v16 = vand.u32 2139095040, %v739_v14  ;;  %v210_v18 = vor.u32 8388608, %v209_v13  ;;  %v306_v20 = vand.u32 2147483647, %v739_v14 }
  0xa3   : > { %v212_v17 = vadd.s32 1, %v500_v15  ;;  %v310_v19 = vshrl.u32 %v309_v16, 23  ;;  %v743_v25 = vshll.u32 %v210_v18, 8  ;;  %v313_v29 = vand.u32 8388607, %v306_v20 }
  0xa5   : > { %vm213_vm0 = vcmp.gt.s32.totalorder %v212_v17, 0  ;;  %v504_v22 = vadd.s32 4294967169, %v310_v19  ;;  %v314_v59 = vor.u32 8388608, %v313_v29 }
  0xa6   : > { %v214_v21 = vsel %vm213_vm0, %v212_v17, 0  ;;  %vm308_vm0 = vcmp.lt.s32.totalorder %v739_v14, 0 }
  0xa7   : > { %v215_v23 = vshrl.u32 %v214_v21, 5  ;;  %v216_v24 = vand.u32 31, %v214_v21  ;;  %v316_v30 = vadd.s32 1, %v504_v22  ;;  %v354_v10 = vshll.u32 %v314_v59, 8 }
  0xa9   : > { %v217_v26 = vsub.s32 32, %v216_v24  ;;  %v219_v28 = vshll.u32 %v646_v27, %v216_v24  ;;  %v222_v32 = vshll.u32 %v647_v31, %v216_v24  ;;  %v225_v34 = vshll.u32 %v648_v33, %v216_v24 }
  0xaa   : > { %v228_v36 = vshll.u32 %v649_v35, %v216_v24  ;;  %v231_v38 = vshll.u32 %v650_v37, %v216_v24  ;;  %vm234_vm1 = vcmp.lt.s32.totalorder %v215_v23, 1  ;;  %vm236_vm2 = vcmp.lt.s32.totalorder %v215_v23, 3 }
  0xab   : > { %v220_v39 = vshrl.u32 %v647_v31, %v217_v26  ;;  %v223_v40 = vshrl.u32 %v648_v33, %v217_v26  ;;  %v226_v41 = vshrl.u32 %v649_v35, %v217_v26  ;;  %v218_v42 = vshrl.u32 %v646_v27, %v217_v26 }
  0xac   : > { %v229_v43 = vshrl.u32 %v650_v37, %v217_v26  ;;  %v232_v45 = vshrl.u32 %v651_v44, %v217_v26  ;;  %vm317_vm3 = vcmp.gt.s32.totalorder %v316_v30, 0  ;;  %vm237_vm4 = vcmp.lt.s32.totalorder %v215_v23, 4 }
  0xad   : > { %v221_v46 = vor.u32 %v220_v39, %v219_v28  ;;  %v224_v47 = vor.u32 %v223_v40, %v222_v32  ;;  %v227_v48 = vor.u32 %v226_v41, %v225_v34  ;;  %v318_v51 = vsel %vm317_vm3, %v316_v30, 0 }
  0xae   : > { %v230_v49 = vor.u32 %v229_v43, %v228_v36  ;;  %v233_v50 = vor.u32 %v232_v45, %v231_v38  ;;  %vm235_vm5 = vcmp.lt.s32.totalorder %v215_v23, 2  ;;  %v320_v62 = vand.u32 31, %v318_v51 }
  0xaf   : > { %v238_v52 = vsel %vm234_vm1, %v218_v42, %v221_v46  ;;  %v239_v53 = vsel %vm237_vm4, %v227_v48, 2102212464  ;;  %v242_v54 = vsel %vm234_vm1, %v221_v46, %v224_v47  ;;  %v246_v55 = vsel %vm234_vm1, %v224_v47, %v227_v48 }
  0xb0   : > { %v240_v56 = vsel %vm236_vm2, %v224_v47, %v239_v53  ;;  %v243_v57 = vsel %vm237_vm4, %v230_v49, 920167782  ;;  %v247_v58 = vsel %vm237_vm4, %v233_v50, 1326507024  ;;  %v319_v6 = vshrl.u32 %v318_v51, 5 }
  0xb1   : > { %v244_v60 = vsel %vm236_vm2, %v227_v48, %v243_v57  ;;  %v248_v61 = vsel %vm236_vm2, %v230_v49, %v247_v58  ;;  %v241_v63 = vsel %vm235_vm5, %v238_v52, %v240_v56  ;;  %v321_v8 = vsub.s32 32, %v320_v62 }
  0xb2   : > { %v245_v0 = vsel %vm235_vm5, %v242_v54, %v244_v60  ;;  %v249_v1 = vsel %vm235_vm5, %v246_v55, %v248_v61  ;;  %v257_v11 = vmul.u32 %v743_v25, %v241_v63  ;;  %v323_v12 = vshll.u32 %v646_v27, %v320_v62 }
  0xb3   : > { %v756_v2 = vmul.u32.u64.low %v743_v25, %v249_v1  ;;  %v757_v3 = vmul.u32.u64.high %v743_v25, %v249_v1, %v756_v2  ;;  %v760_v4 = vmul.u32.u64.low %v743_v25, %v245_v0  ;;  %v761_v5 = vmul.u32.u64.high %v743_v25, %v245_v0, %v760_v4 }
  0xb4   : > { %v326_v13 = vshll.u32 %v647_v31, %v320_v62  ;;  %v329_v15 = vshll.u32 %v648_v33, %v320_v62  ;;  %v324_v16 = vshrl.u32 %v647_v31, %v321_v8  ;;  %v327_v17 = vshrl.u32 %v648_v33, %v321_v8 }
  0xb5   : > { %v330_v18 = vshrl.u32 %v649_v35, %v321_v8  ;;  %v332_v19 = vshll.u32 %v649_v35, %v320_v62  ;;  %vm259_vm6 = vc.u32 %v757_v3, %v760_v4  ;;  %v260_v21 = vadd.s32 1, %v761_v5 }
  0xb6   : > { %v333_v22 = vshrl.u32 %v650_v37, %v321_v8  ;;  %v335_v23 = vshll.u32 %v650_v37, %v320_v62  ;;  %v325_v24 = vor.u32 %v324_v16, %v323_v12  ;;  %v328_v26 = vor.u32 %v327_v17, %v326_v13 }
  0xb7   : > { %v331_v28 = vor.u32 %v330_v18, %v329_v15  ;;  %v336_v29 = vshrl.u32 %v651_v44, %v321_v8  ;;  %v261_v25 = vsel %vm259_vm6, %v260_v21, %v761_v5  ;;  %vm338_vm7 = vcmp.lt.s32.totalorder %v319_v6, 1 }
  0xb8   : > { %v334_v30 = vor.u32 %v333_v22, %v332_v19  ;;  %vm341_vm8 = vcmp.lt.s32.totalorder %v319_v6, 4  ;;  %v262_v31 = vadd.s32 %v261_v25, %v257_v11  ;;  %vm340_vm9 = vcmp.lt.s32.totalorder %v319_v6, 3 }
  0xb9   : > { %v337_v32 = vor.u32 %v336_v29, %v335_v23  ;;  %v343_v33 = vsel %vm341_vm8, %v331_v28, 2102212464  ;;  %v322_v34 = vshrl.u32 %v646_v27, %v321_v8  ;;  %v346_v35 = vsel %vm338_vm7, %v325_v24, %v328_v26 }
  0xba   : > { %v347_v36 = vsel %vm341_vm8, %v334_v30, 920167782  ;;  %v350_v38 = vsel %vm338_vm7, %v328_v26, %v331_v28  ;;  %v263_v39 = vadd.s32 536870912, %v262_v31  ;;  %vm339_vm10 = vcmp.lt.s32.totalorder %v319_v6, 2 }
  0xbb   : > { %v348_v37 = vsel %vm340_vm9, %v331_v28, %v347_v36  ;;  %v351_v40 = vsel %vm341_vm8, %v337_v32, 1326507024  ;;  %v342_v41 = vsel %vm338_vm7, %v322_v34, %v325_v24  ;;  %v344_v42 = vsel %vm340_vm9, %v328_v26, %v343_v33 }
  0xbc   : > { %v349_v43 = vsel %vm339_vm10, %v346_v35, %v348_v37  ;;  %v352_v44 = vsel %vm340_vm9, %v334_v30, %v351_v40  ;;  %v264_v45 = vshrl.u32 %v263_v39, 30  ;;  %v345_v51 = vsel %vm339_vm10, %v342_v41, %v344_v42 }
  0xbd   : > { %v353_v46 = vsel %vm339_vm10, %v350_v38, %v352_v44  ;;  %v771_v47 = vmul.u32.u64.low %v354_v10, %v349_v43  ;;  %v772_v48 = vmul.u32.u64.high %v354_v10, %v349_v43, %v771_v47  ;;  %v361_v54 = vmul.u32 %v354_v10, %v345_v51 }
  0xbe   : > { %v774_v49 = vmul.u32.u64.low %v354_v10, %v353_v46  ;;  %v775_v50 = vmul.u32.u64.high %v354_v10, %v353_v46, %v774_v49  ;;  %v265_v27 = vshll.u32 %v264_v45, 30  ;;  %v258_v2 = vadd.s32 %v760_v4, %v757_v3 }
  0xbf   : > { %v364_v53 = vadd.s32 1, %v772_v48  ;;  %v288_v24 = vsub.s32 4, %v264_v45  ;;  %vm791_vm1 = vcmp.le.f32.partialorder %v306_v20, 0.7853982  ;;  %vm294_vm5 = vweird.f32 %v733_v7 }
  0xc0   : > { %v266_v52 = vsub.s32 %v262_v31, %v265_v27  ;;  %vm363_vm11 = vc.u32 %v775_v50, %v771_v47  ;;  %v362_v3 = vadd.s32 %v771_v47, %v775_v50  ;;  %vm398_vm9 = vweird.f32 %v739_v14 }
  0xc1   : > { %v365_v56 = vsel %vm363_vm11, %v364_v53, %v772_v48  ;;  %v289_v33 = vsel %vm204_vm14, %v288_v24, %v264_v45 }
  0xc2   : > { %v268_v55 = vsub.s32 0, %v266_v52  ;;  %v366_v57 = vadd.s32 %v365_v56, %v361_v54  ;;  %v291_v38 = vsel %vm203_vm15, 0, %v289_v33 }
  0xc3   : > { %v295_v41 = vadd.s32 3, %v291_v38 }
  0xc4   : > { %v501_v58 = vmin.u32 %v268_v55, %v266_v52  ;;  %v367_v59 = vadd.s32 536870912, %v366_v57 }
  0xc5   : > { %v296_v9 = vand.u32 3, %v295_v41 }
  0xc6   : > { %v270_v60 = vclz %v501_v58  ;;  %v368_v61 = vshrl.u32 %v367_v59, 30 }
  0xc7   : > { %vm301_vm2 = vcmp.eq.s32.totalorder %v296_v9, 2  ;;  %vm298_vm3 = vcmp.eq.s32.totalorder %v296_v9, 0  ;;  %vm297_vm4 = vcmp.lt.s32.totalorder %v296_v9, 2 }
  0xc8   : > { %v502_v62 = vadd.s32 4294967294, %v270_v60  ;;  %v369_v63 = vshll.u32 %v368_v61, 30  ;;  %v392_v43 = vsub.s32 4, %v368_v61 }
  0xca   : > { %vm503_vm12 = vcmp.lt.s32.totalorder %v502_v62, 0  ;;  %v370_v1 = vsub.s32 %v366_v57, %v369_v63  ;;  %v393_v47 = vsel %vm308_vm0, %v392_v43, %v368_v61 }
  0xcb   : > { %v273_v0 = vsel %vm503_vm12, 0, %v502_v62  ;;  %v395_v20 = vsel %vm791_vm1, 0, %v393_v47 }
  0xcc   : > { %v274_v5 = vsub.s32 32, %v273_v0  ;;  %v278_v6 = vsub.s32 4294967266, %v273_v0  ;;  %v372_v8 = vsub.s32 0, %v370_v1  ;;  %v275_v10 = vshll.u32 %v266_v52, %v273_v0 }
  0xcd   : > { %v399_v55 = vadd.s32 3, %v395_v20 }
  0xce   : > { %v276_v11 = vshrl.u32 %v258_v2, %v274_v5  ;;  %v279_v12 = vadd.s32 127, %v278_v6  ;;  %v505_v13 = vmin.u32 %v372_v8, %v370_v1 }
  0xcf   : > { %v400_v57 = vand.u32 3, %v399_v55 }
  0xd0   : > { %v277_v15 = vor.u32 %v276_v11, %v275_v10  ;;  %v280_v16 = vshll.u32 %v279_v12, 23  ;;  %v374_v17 = vclz %v505_v13 }
  0xd1   : > { %vm405_vm6 = vcmp.eq.s32.totalorder %v400_v57, 2  ;;  %vm402_vm7 = vcmp.eq.s32.totalorder %v400_v57, 0  ;;  %vm401_vm8 = vcmp.lt.s32.totalorder %v400_v57, 2 }
  0xd2   : > { %v281_v18 = vor.u32 4788187, %v280_v16  ;;  %v506_v19 = vadd.s32 4294967294, %v374_v17  ;;  %v284_v22 = vcvt.s32.f32 %v277_v15 }
  0xd4   : > { %v282_v21 = vand.u32 2147483647, %v281_v18  ;;  %vm507_vm13 = vcmp.lt.s32.totalorder %v506_v19, 0 }
  0xd5   : > { %v377_v26 = vsel %vm507_vm13, 0, %v506_v19 }
  0xd6   : > { %v285_v23 = vmul.f32 %v284_v22, %v282_v21  ;;  %v378_v4 = vsub.s32 32, %v377_v26  ;;  %v382_v28 = vsub.s32 4294967266, %v377_v26  ;;  %v379_v25 = vshll.u32 %v370_v1, %v377_v26 }
  0xd8   : > { %v286_v29 = vxor.u32 2147483648, %v285_v23  ;;  %v380_v30 = vshrl.u32 %v362_v3, %v378_v4  ;;  %v383_v31 = vadd.s32 127, %v382_v28 }
  0xda   : > { %v287_v32 = vsel %vm204_vm14, %v286_v29, %v285_v23  ;;  %v381_v35 = vor.u32 %v380_v30, %v379_v25  ;;  %v384_v36 = vshll.u32 %v383_v31, 23 }
  0xdb   : > { %v290_v34 = vsel %vm203_vm15, %v733_v7, %v287_v32 }
  0xdc   : > { %573 = vcosq.f32 %v290_v34  ;;  %v385_v39 = vor.u32 4788187, %v384_v36  ;;  %v388_v40 = vcvt.s32.f32 %v381_v35 }
  0xdd   : > { %575 = vsinq.f32 %v290_v34 }
  0xde   : > { %v386_v37 = vand.u32 2147483647, %v385_v39 }
  0xe0   : > { %v389_v42 = vmul.f32 %v388_v40, %v386_v37 }
  0xe2   : > { %v390_v44 = vxor.u32 2147483648, %v389_v42 }
  0xe4   : > { %v391_v46 = vsel %vm308_vm0, %v390_v44, %v389_v42 }
  0xe5   : > { %v394_v49 = vsel %vm791_vm1, %v739_v14, %v391_v46 }
  0xe6   : > { %v574_v48 = vpop.eup %573  ;;  %577 = vcosq.f32 %v394_v49 }
  0xe7   : > { %v576_v50 = vpop.eup %575  ;;  %v302_v27 = vxor.u32 2147483648, %v574_v48  ;;  %579 = vsinq.f32 %v394_v49 }
  0xe8   : > { %v299_v51 = vxor.u32 2147483648, %v576_v50 }
  0xe9   : > { %v303_v52 = vsel %vm301_vm2, %v302_v27, %v576_v50 }
  0xea   : > { %v300_v53 = vsel %vm298_vm3, %v574_v48, %v299_v51 }
  0xeb   : > { %v304_v54 = vsel %vm297_vm4, %v300_v53, %v303_v52 }
  0xec   : > { %v305_v56 = vsel %vm294_vm5, nan, %v304_v54 }
  0xed   : > { %410 = vst [vmem:[%s164_s8] sm:$0xff] %v305_v56  ;;  %412 = vst [vmem:[%s164_s8 + $0x8] sm:$0xff] %v305_v56 }
  0xf0   : > { %v578_v58 = vpop.eup %577 }
  0xf1   : > { %v580_v59 = vpop.eup %579  ;;  %v406_v60 = vxor.u32 2147483648, %v578_v58 }
  0xf2   : > { %v403_v61 = vxor.u32 2147483648, %v580_v59 }
  0xf3   : > { %v407_v62 = vsel %vm405_vm6, %v406_v60, %v580_v59 }
  0xf4   : > { %v404_v7 = vsel %vm402_vm7, %v578_v58, %v403_v61 }
  0xf5   : > { %v408_v63 = vsel %vm401_vm8, %v404_v7, %v407_v62 }
  0xf6   : > { %v409_v0 = vsel %vm398_vm9, nan, %v408_v63 }
  0xf7   : > { %411 = vst [vmem:[%s164_s8 + $0x10] sm:$0xff] %v409_v0  ;;  %413 = vst [vmem:[%s164_s8 + $0x18] sm:$0xff] %v409_v0 }
  0xf8   : > { %594 = shalt.err (!%p591_p3)
}
  0xf9   : > { %s595_s27 = scalar_lea.hbm %s807_s19, 512  ;;  %s599_s30 = scalar_lea.hbm %s858_s3, 1024 }
  0xfa   : > { %p596_p4 = scmp.ne.s32.totalorder %s807_s19, %s595_s27  ;;  %p600_p9 = scmp.lt.u32.totalorder %s807_s19, %s858_s3 }
  0xfb   : > { %p601_p10 = scmp.lt.u32.totalorder %s599_s30, %s595_s27  ;;  %p603_p12 = scmp.lt.u32.totalorder %s595_s27, %s807_s19 }
  0xfc   : > { %p597_p7 = pnand %p596_p4, %p713_p5 }
  0xfd   : > { %p602_p11 = por %p601_p10, %p600_p9 }
  0xfe   : > { %p598_p8 = pneg %p597_p7 }
  0xff   : > { %p604_p13 = por %p603_p12, %p602_p11 }
 0x101   : > { %p605_p0 = pnand %p604_p13, %p598_p8 }
 0x103   : > { %608 = shalt.err (!%p605_p0)
}
 0x104   : > { %s653_s6 = smov 128   ;;  %s654_s7 = smov 8  }
 0x105   : > { %524 = dma.vmem_to_hbm [thread:$0]  (%p713_p5), %s809_s10, 512, %s807_s19, %s814_s16, %s653_s6, %s653_s6, %s654_s7  }
 0x106 PF: > { %p530_p1 = scmp.ge.s32.totalorder %s643_s15, 2  ;;  %s444_s8 = sand.u32 1, %s631_s12  }
 0x107   : > { %s445_s9 = scalar_lea.sflag [#allocation3], %s444_s8 }
 0x108   : > { %p527_p2 = pnand %p530_p1, %p717_p6 }
 0x10a   : > { %626 = dma.done.wait (!%p527_p2), %s445_s9, 512  }
 0x10b   : > { %628 = vsyncadd (!%p527_p2), %s445_s9, 4294966784  ;;  %p13_p3 = scmp.ge.s32.totalorder %s700_s18, 4   ;;  %s863_s12 = smov %s635_s13 }
 0x10c   : > { %s864_s13 = smov %s639_s14  ;;  %s865_s14 = smov %s711_s21 }
 0x10d   : > { %s866_s15 = smov %s700_s18  ;;  %15 = sbr.rel (!%p13_p3) target bundleno = 3 (0x3), region = 67 }
 0x114   :  { %450 = vsyncpa [#allocation3], 1 }
 0x115   :  { %452 = vsyncpa [#allocation3 + $0x1], 1 }

</bundles_post_ra>
